<compile_context>
chip_gen: v7x
topology: tpu7x:2x2x1
jax: 0.10.0
libtpu: 0.0.40
codegen_flags: <defaults>
</compile_context>

<pallas_src>
import math

import jax
import jax.numpy as jnp
from jax.experimental import pallas as pl
from jax.experimental.pallas import tpu as pltpu


def _round_up(x, m):
    return ((x + m - 1) // m) * m


def _cdiv(a, b):
    return -(-a // b)


# ----------------------------- kernels --------------------------------------


def _linear_kernel_single(x_ref, w_ref, b_ref, o_ref):
    # Whole K resident: one MXU pass, fused bias add, no scratch, no pl.when.
    o_ref[...] = (
        jnp.dot(x_ref[...], w_ref[...], preferred_element_type=jnp.float32)
        + b_ref[...]
    ).astype(o_ref.dtype)


def _linear_kernel_multi_f32(x_ref, w_ref, b_ref, o_ref):
    # f32 output: accumulate directly into the resident output block
    # (output block index is constant across the innermost "arbitrary" K axis).
    k = pl.program_id(2)

    @pl.when(k == 0)
    def _():
        o_ref[...] = jnp.zeros_like(o_ref)

    o_ref[...] += jnp.dot(
        x_ref[...], w_ref[...], preferred_element_type=jnp.float32
    )

    @pl.when(k == pl.num_programs(2) - 1)
    def _():
        o_ref[...] += b_ref[...]


def _linear_kernel_multi_acc(x_ref, w_ref, b_ref, o_ref, acc_ref):
    # Narrow output dtype: f32 VMEM accumulator, cast once on the last K step.
    k = pl.program_id(2)

    @pl.when(k == 0)
    def _():
        acc_ref[...] = jnp.zeros_like(acc_ref)

    acc_ref[...] += jnp.dot(
        x_ref[...], w_ref[...], preferred_element_type=jnp.float32
    )

    @pl.when(k == pl.num_programs(2) - 1)
    def _():
        o_ref[...] = (acc_ref[...] + b_ref[...]).astype(o_ref.dtype)


# --------------------------- tile planning ----------------------------------


def _chip_caps():
    """Chip-aware tile caps and scoped-VMEM budget."""
    vmem_bytes = 64 * 1024 * 1024  # conservative default (v7x-sized)
    try:
        info = pltpu.get_tpu_info()
        vmem_bytes = int(getattr(info, "vmem_capacity_bytes", vmem_bytes))
    except Exception:
        pass
    if vmem_bytes >= 100 * 1024 * 1024:  # v5e / v6e: 128 MiB per TensorCore
        return dict(cap_m=1024, cap_n=1024, cap_k=4096,
                    vmem_limit=96 * 1024 * 1024)
    # v7x (64 MiB per TensorCore) or unknown: keep the smaller budget.
    return dict(cap_m=512, cap_n=512, cap_k=2048,
                vmem_limit=48 * 1024 * 1024)


def _plan_nk(N, K, caps):
    """Choose (N_pad, tile_n, K_pad, tile_k) without over-padding."""
    # N: pad only to the 128-lane minimum; tile_n must be a divisor of N_pad
    # (lane-dense, unmasked vst; never rounds N_pad up to the tile cap).
    N_pad = _round_up(N, 128)
    tile_n = 128
    for d in range(min(N_pad, caps["cap_n"]) // 128, 0, -1):
        if N_pad % (128 * d) == 0:
            tile_n = 128 * d
            break
    # K: whole-K resident when it fits (single-step fast path, no padding);
    # otherwise split into the fewest ~equal 256-aligned chunks (256-deep MXU
    # on v6e/v7x), which bounds K over-padding to < 256 per chunk.
    if K <= caps["cap_k"]:
        tile_k, K_pad = K, K
    else:
        nk = _cdiv(K, caps["cap_k"])
        tile_k = _round_up(_cdiv(K, nk), 256)
        K_pad = nk * tile_k
    return N_pad, tile_n, K_pad, tile_k


def _plan_m(M, itemsize, caps, grid_n):
    """Choose tile_m (never pads x along M; ragged edge blocks are masked)."""
    m_align = max(8, 32 // itemsize)  # 8 rows f32, 16 bf16, 32 int8
    tile_m = min(_round_up(M, m_align), caps["cap_m"])
    tile_m = _round_up(tile_m, m_align)
    grid_m = _cdiv(M, tile_m)
    # Megacore: guarantee >= 2 parallel grid steps when the problem allows it
    # (up to ~2x on v7x's two TensorCores; costs one ~0.35us step elsewhere).
    if grid_m * grid_n == 1 and M > m_align:
        tile_m = _round_up(_cdiv(tile_m, 2), m_align)
    return tile_m


# ------------------------------ wrappers ------------------------------------


def prepare_linear_params(weight, bias, x_dtype=None, *, max_tile_k=None):
    """One-time layout plumbing (hoist out of the per-call path):
    weight [N, K] -> padded W^T [K_pad, N_pad] in MXU layout, bias -> f32 [1, N_pad]."""
    N, K = weight.shape
    assert bias.shape == (N,)
    dtype = x_dtype if x_dtype is not None else weight.dtype
    itemsize = jnp.dtype(dtype).itemsize

    caps = dict(_chip_caps())
    if max_tile_k is not None:
        caps["cap_k"] = int(max_tile_k)

    N_pad, tile_n, K_pad, tile_k = _plan_nk(N, K, caps)

    w_t = weight.T  # [K, N], transposed once
    if (K_pad, N_pad) != (K, N):
        w_t = jnp.pad(w_t, ((0, K_pad - K), (0, N_pad - N)))
    b_p = bias.astype(jnp.float32)
    if N_pad != N:
        b_p = jnp.pad(b_p, (0, N_pad - N))
    b_p = b_p.reshape(1, N_pad)

    meta = dict(N=N, K=K, N_pad=N_pad, K_pad=K_pad,
                tile_n=tile_n, tile_k=tile_k, itemsize=itemsize, caps=caps)
    return w_t, b_p, meta


def apply_linear_classifier(x, w_prepared, b_prepared, meta):
    """y = x @ W^T + b with pre-transposed / pre-padded params."""
    orig_shape = x.shape
    K = orig_shape[-1]
    assert K == meta["K"], "in_dim mismatch"
    x2 = x.reshape(-1, K)
    M = x2.shape[0]

    N, N_pad, K_pad = meta["N"], meta["N_pad"], meta["K_pad"]
    tile_n, tile_k = meta["tile_n"], meta["tile_k"]
    caps = meta["caps"]
    out_dtype = x.dtype
    itemsize = jnp.dtype(out_dtype).itemsize

    # Zero-fill K only when a partial K tile would otherwise read garbage.
    if K_pad != K:
        x2 = jnp.pad(x2, ((0, 0), (0, K_pad - K)))

    grid_n = N_pad // tile_n
    grid_k = K_pad // tile_k
    tile_m = _plan_m(M, itemsize, caps, grid_n)
    grid_m = _cdiv(M, tile_m)

    flops = 2 * M * N * K
    # Advisory: account for x re-reads per N tile and W re-reads per M tile.
    bytes_accessed = (M * K_pad * itemsize * grid_n
                      + K_pad * N_pad * itemsize * grid_m
                      + N_pad * 4
                      + M * N_pad * itemsize)

    if grid_k == 1:
        kernel = _linear_kernel_single
        grid = (grid_m, grid_n)
        in_specs = [
            pl.BlockSpec((tile_m, tile_k), lambda i, j: (i, 0)),   # x
            pl.BlockSpec((tile_k, tile_n), lambda i, j: (0, j)),   # W^T
            pl.BlockSpec((1, tile_n), lambda i, j: (0, j)),        # bias (f32)
        ]
        out_specs = pl.BlockSpec((tile_m, tile_n), lambda i, j: (i, j))
        scratch_shapes = []
        semantics = ("parallel", "parallel")
    else:
        grid = (grid_m, grid_n, grid_k)
        in_specs = [
            pl.BlockSpec((tile_m, tile_k), lambda i, j, k: (i, k)),  # x
            pl.BlockSpec((tile_k, tile_n), lambda i, j, k: (k, j)),  # W^T
            pl.BlockSpec((1, tile_n), lambda i, j, k: (0, j)),       # bias
        ]
        out_specs = pl.BlockSpec((tile_m, tile_n), lambda i, j, k: (i, j))
        semantics = ("parallel", "parallel", "arbitrary")
        if jnp.dtype(out_dtype) == jnp.dtype(jnp.float32):
            kernel = _linear_kernel_multi_f32     # accumulate in o_ref
            scratch_shapes = []
        else:
            kernel = _linear_kernel_multi_acc     # f32 scratch accumulator
            scratch_shapes = [pltpu.VMEM((tile_m, tile_n), jnp.float32)]

    out = pl.pallas_call(
        kernel,
        out_shape=jax.ShapeDtypeStruct((M, N_pad), out_dtype),
        grid_spec=pltpu.PrefetchScalarGridSpec(
            num_scalar_prefetch=0,
            grid=grid,
            in_specs=in_specs,
            out_specs=out_specs,
            scratch_shapes=scratch_shapes,
        ),
        compiler_params=pltpu.CompilerParams(
            dimension_semantics=semantics,
            vmem_limit_bytes=caps["vmem_limit"],
        ),
        cost_estimate=pl.CostEstimate(
            flops=flops, transcendentals=0, bytes_accessed=bytes_accessed
        ),
    )(x2, w_prepared, b_prepared)

    if N_pad != N:
        out = out[:, :N]
    return out.reshape(orig_shape[:-1] + (N,))


def linear_classifier(x, weight, bias, *, max_tile_k=None):
    """Convenience wrapper: y = x @ weight.T + bias (PyTorch nn.Linear layout).

    For repeated calls with the same params, call prepare_linear_params() once
    and use apply_linear_classifier() so the weight transpose/pad is not
    re-done every step (it constant-folds under jit with constant params).
    """
    w_p, b_p, meta = prepare_linear_params(
        weight, bias, x.dtype, max_tile_k=max_tile_k
    )
    return apply_linear_classifier(x, w_p, b_p, meta)


def init_linear_params(key, in_dim, n_classes, dtype=jnp.float32):
    """Deterministic init mirroring torch.nn.Linear defaults:
    weight, bias ~ U(-1/sqrt(in_dim), 1/sqrt(in_dim))."""
    kw, kb = jax.random.split(key)
    bound = 1.0 / math.sqrt(in_dim)
    weight = jax.random.uniform(
        kw, (n_classes, in_dim), dtype=dtype, minval=-bound, maxval=bound
    )
    bias = jax.random.uniform(
        kb, (n_classes,), dtype=dtype, minval=-bound, maxval=bound
    )
    return weight, bias


if __name__ == "__main__":
    key = jax.random.PRNGKey(0)
    k_x1, k_p1, k_x2, k_p2, k_x3, k_p3 = jax.random.split(key, 6)

    # --- 1) small module-consistent shapes (single-K fast path) --------------
    batch, in_dim, n_classes = 8, 32, 16
    x = jax.random.normal(k_x1, (batch, in_dim), dtype=jnp.float32)
    weight, bias = init_linear_params(k_p1, in_dim, n_classes)
    out = jax.block_until_ready(linear_classifier(x, weight, bias))
    ref = x @ weight.T + bias
    assert out.shape == (batch, n_classes)
    assert jnp.allclose(out, ref, atol=1e-5, rtol=1e-5), "mismatch (fast path)"

    # --- 2) ragged M + K-split path (f32, accumulate into o_ref) -------------
    b2, k2, n2 = 20, 384, 272
    x2 = jax.random.normal(k_x2, (b2, k2), dtype=jnp.float32)
    w2, bias2 = init_linear_params(k_p2, k2, n2)
    w_p, b_p, meta = prepare_linear_params(w2, bias2, x2.dtype, max_tile_k=256)
    out2 = jax.block_until_ready(apply_linear_classifier(x2, w_p, b_p, meta))
    ref2 = x2 @ w2.T + bias2
    assert out2.shape == (b2, n2)
    assert jnp.allclose(out2, ref2, atol=1e-4, rtol=1e-4), "mismatch (K-split f32)"

    # --- 3) bf16 K-split path (f32 scratch accumulator kernel) ---------------
    b3, k3, n3 = 16, 384, 40
    x3 = jax.random.normal(k_x3, (b3, k3), dtype=jnp.float32).astype(jnp.bfloat16)
    w3f, bias3f = init_linear_params(k_p3, k3, n3)
    w3, bias3 = w3f.astype(jnp.bfloat16), bias3f.astype(jnp.bfloat16)
    out3 = jax.block_until_ready(linear_classifier(x3, w3, bias3, max_tile_k=256))
    ref3 = (x3.astype(jnp.float32) @ w3.astype(jnp.float32).T
            + bias3.astype(jnp.float32))
    assert out3.shape == (b3, n3)
    assert jnp.allclose(out3.astype(jnp.float32), ref3, atol=0.25, rtol=2e-2), \
        "mismatch (K-split bf16)"

    print("KERNEL_OK")
</pallas_src>

<mosaic_0001>
module attributes {stable_mosaic.version = 11 : i64} {
  func.func @_linear_kernel_single(%arg0: i32, %arg1: i32, %arg2: memref<8x32xf32, #tpu.memory_space<vmem>>, %arg3: memref<32x128xf32, #tpu.memory_space<vmem>>, %arg4: memref<1x128xf32, #tpu.memory_space<vmem>>, %arg5: memref<8x128xf32, #tpu.memory_space<vmem>>) attributes {dimension_semantics = [#tpu.dimension_semantics<parallel>, #tpu.dimension_semantics<parallel>], iteration_bounds = array<i64: 1, 1>, scalar_prefetch = 0 : i64, scratch_operands = 0 : i64, tpu.core_type = #tpu.core_type<tc>, window_params = [{transform_indices = @transform_0, window_bounds = array<i64: 8, 32>}, {transform_indices = @transform_1, window_bounds = array<i64: 32, 128>}, {transform_indices = @transform_2, window_bounds = array<i64: 1, 128>}, {transform_indices = @transform_3, window_bounds = array<i64: 8, 128>}]} {
    %c0 = arith.constant 0 : index
    %c0_0 = arith.constant 0 : index
    %0 = vector.load %arg2[%c0, %c0_0] : memref<8x32xf32, #tpu.memory_space<vmem>>, vector<8x32xf32>
    %c0_1 = arith.constant 0 : index
    %c0_2 = arith.constant 0 : index
    %1 = vector.load %arg3[%c0_1, %c0_2] : memref<32x128xf32, #tpu.memory_space<vmem>>, vector<32x128xf32>
    %cst = arith.constant dense<0.000000e+00> : vector<8x128xf32>
    %2 = tpu.matmul %0, %1, %cst {dimension_numbers = #tpu.dot_dimension_numbers<[1], [0], [0], [1], [0, 0, 1, 1], [], []>} : vector<8x32xf32>, vector<32x128xf32>, vector<8x128xf32> -> vector<8x128xf32>
    %c0_3 = arith.constant 0 : index
    %c0_4 = arith.constant 0 : index
    %3 = vector.load %arg4[%c0_3, %c0_4] : memref<1x128xf32, #tpu.memory_space<vmem>>, vector<1x128xf32>
    %4 = vector.broadcast %3 : vector<1x128xf32> to vector<8x128xf32>
    %5 = arith.addf %2, %4 : vector<8x128xf32>
    %c0_5 = arith.constant 0 : index
    %c0_6 = arith.constant 0 : index
    %6 = vector.load %arg5[%c0_5, %c0_6] : memref<8x128xf32, #tpu.memory_space<vmem>>, vector<8x128xf32>
    tpu.vector_store %arg5[%c0_5, %c0_6], %5 {strides = array<i32>} : memref<8x128xf32, #tpu.memory_space<vmem>>, vector<8x128xf32>,
    return
  }
  func.func @transform_0(%arg0: i32, %arg1: i32) -> (i32, i32) {
    %c0_i32 = arith.constant 0 : i32
    %c0_i32_0 = arith.constant 0 : i32
    return %arg0, %c0_i32 : i32, i32
  }
  func.func @transform_1(%arg0: i32, %arg1: i32) -> (i32, i32) {
    %c0_i32 = arith.constant 0 : i32
    %c0_i32_0 = arith.constant 0 : i32
    return %c0_i32, %arg1 : i32, i32
  }
  func.func @transform_2(%arg0: i32, %arg1: i32) -> (i32, i32) {
    %c0_i32 = arith.constant 0 : i32
    %c0_i32_0 = arith.constant 0 : i32
    return %c0_i32, %arg1 : i32, i32
  }
  func.func @transform_3(%arg0: i32, %arg1: i32) -> (i32, i32) {
    %c0_i32 = arith.constant 0 : i32
    return %arg0, %arg1 : i32, i32
  }
}

</mosaic_0001>

<bundles_post_ra>
// kernel: tpu_custom_call.1
= control target key start
LH: loop header
LB: loop body
LE: loop exit
PB: predicated region body
PF: predicated region fallthrough
CT: control target
= control target key end

     0   :  { %8 = vsyncpa [#allocation3], 0  ;;  %s322_s0 = inlined_call_operand.hbm [shape: f32[8,32], index: 0, kind: input, shape index: {}]   ;;  %s323_s1 = inlined_call_operand.hbm [shape: f32[32,128], index: 1, kind: input, shape index: {}]   ;;  %s324_s2 = inlined_call_operand.vmem [shape: f32[1,128], index: 2, kind: input, shape index: {}]   ;;  %s325_s3 = inlined_call_operand.hbm [shape: f32[8,128], index: 3, kind: output, shape index: {}]  }
   0x1   :  { %9 = vsyncpa [#allocation6], 0 }
   0x2   :  { %10 = vsyncpa [#allocation4], 0  ;;  %s248_s12 = smov [#allocation2]   ;;  %s249_s14 = smov [#allocation5]  }
   0x3   :  { %s17_s13 = sshll.u32 %s248_s12, 4  ;;  %s26_s15 = sshll.u32 %s249_s14, 4  ;;  %s18_s13 = int_to_ptr.vmem [resolvable:$true] %s17_s13  ;;  %s276_s15 = int_to_ptr.vmem [resolvable:$true] %s26_s15 }
   0x4   :  { %s176_s18 = scalar_lea.hbm %s322_s0, 128 }
   0x5   :  { %p177_p0 = scmp.ne.s32.totalorder %s322_s0, %s176_s18  ;;  %p180_p1 = scmp.lt.u32.totalorder %s176_s18, %s322_s0 }
   0x7   :  { %p182_p2 = pnand %p180_p1, %p177_p0 }
   0x9   :  { %185 = shalt.err (!%p182_p2)
}
   0xa   :  { %s186_s23 = scalar_lea.vmem %s18_s13, 128  ;;  %p191_p4 = scmp.lt.s32.totalorder %s18_s13, %s18_s13 }
   0xb   :  { %p187_p3 = scmp.ne.s32.totalorder %s18_s13, %s186_s23  ;;  %p192_p5 = scmp.lt.s32.totalorder %s186_s23, %s186_s23 }
   0xd   :  { %p193_p6 = por %p192_p5, %p191_p4 }
   0xf   :  { %p194_p7 = pnand %p193_p6, %p187_p3 }
  0x11   :  { %197 = shalt.err (!%p194_p7)
}
  0x12   :  { %20 = dma.hbm_to_vmem [thread:$0]  %s322_s0, 128, %s18_s13, [#allocation3]  }
  0x13   :  { %s198_s28 = scalar_lea.hbm %s323_s1, 512 }
  0x14   :  { %p199_p8 = scmp.ne.s32.totalorder %s323_s1, %s198_s28  ;;  %p202_p9 = scmp.lt.u32.totalorder %s198_s28, %s323_s1 }
  0x16   :  { %p204_p10 = pnand %p202_p9, %p199_p8 }
  0x18   :  { %207 = shalt.err (!%p204_p10)
}
  0x19   :  { %s208_s6 = scalar_lea.vmem %s276_s15, 512  ;;  %p213_p12 = scmp.lt.s32.totalorder %s276_s15, %s276_s15 }
  0x1a   :  { %p209_p11 = scmp.ne.s32.totalorder %s276_s15, %s208_s6  ;;  %p214_p13 = scmp.lt.s32.totalorder %s208_s6, %s208_s6 }
  0x1c   :  { %p215_p0 = por %p214_p13, %p213_p12 }
  0x1e   :  { %p216_p1 = pnand %p215_p0, %p209_p11 }
  0x20   :  { %219 = shalt.err (!%p216_p1)
}
  0x21   :  { %s250_s0 = smov 128   ;;  %s251_s7 = smov 8  }
  0x22   :  { %32 = dma.hbm_to_vmem [thread:$0]  %s323_s1, 512, %s276_s15, [#allocation6], %s250_s0, %s250_s0, %s251_s7  }
  0x23   :  { %242 = dma.done.wait [#allocation3], 128  }
  0x24   :  { %243 = vsyncadd [#allocation3], 4294967168 }
  0x25   :  { %244 = dma.done.wait [#allocation6], 512  }
  0x26   :  { %245 = vsyncadd [#allocation6], 4294966784  ;;  %v252_v0 = vmov 0.0|0.0   ;;  %vm253_vm0 = vmmov 0   ;;  %v254_v1 = vmov 0.0   ;;  %v42_v2 = vld [vmem:[#allocation5] sm:$0xff] }
  0x27   :  { %162 = vmatprep.subr.bf16.mxu0 %v252_v0  ;;  %159 = vmatprep.mubr.msk.f32.mxu0 %vm253_vm0, %v254_v1  ;;  %v43_v3 = vld [vmem:[#allocation5 + $0x8] sm:$0xff]  ;;  %v44_v4 = vld [vmem:[#allocation5 + $0x10] sm:$0xff]  ;;  %v45_v6 = vld [vmem:[#allocation5 + $0x18] sm:$0xff]  ;;  %vm53_vm1 = vcmask 261120   ;;  %s255_s11 = smov [#allocation7]  }
  0x28   :  { %v163_v5 = vpack.c.bf16 %v43_v3, %v42_v2  ;;  %v166_v7 = vpack.c.bf16 %v45_v6, %v44_v4  ;;  %v41_v8 = vld [vmem:[#allocation2] sm:$0xff]  ;;  %s134_s12 = sshll.u32 %s255_s11, 4  ;;  %s135_s12 = int_to_ptr.vmem [resolvable:$true] %s134_s12 }
  0x29   :  { %v144_v9 = vld [vmem:[%s324_s2] ss:$0 sm:$0xff]  ;;  %s220_s13 = scalar_lea.vmem %s135_s12, 128  ;;  %p225_p3 = scmp.lt.s32.totalorder %s135_s12, %s135_s12 }
  0x2a   :  { %164 = vmatpush3.bf16.msra.mxu0 %v163_v5  ;;  %p221_p2 = scmp.ne.s32.totalorder %s135_s12, %s220_s13  ;;  %p226_p4 = scmp.lt.s32.totalorder %s220_s13, %s220_s13 }
  0x2b   :  { %165 = vmatprep.subr.bf16.mxu0 %v252_v0 }
  0x2c   :  { %p227_p5 = por %p226_p4, %p225_p3 }
  0x2e   :  { %167 = vmatpush3.bf16.msra.mxu0 %v166_v7  ;;  %p228_p6 = pnand %p227_p5, %p221_p2 }
  0x31   :  { %160 = vmatmul.mubr.msk.f32.vlgmr.msra.gmra.mrb[0].mxu0 %vm53_vm1, %v41_v8 }
 0x104   :  { %v123_v10 = vpop.f32.mrb[0].mxu0 }
 0x105   :  { %v124_v11 = vadd.f32 %v144_v9, %v123_v10  ;;  %v161_v12 = vpop.f32.mrb[1].mxu0 }
 0x107   :  { %127 = vst [vmem:[#allocation7] sm:$0xff] %v124_v11 }
 0x108   :  { %231 = shalt.err (!%p228_p6)
}
 0x109   :  { %s232_s16 = scalar_lea.hbm %s325_s3, 128 }
 0x10a   :  { %p233_p7 = scmp.ne.s32.totalorder %s325_s3, %s232_s16  ;;  %p236_p8 = scmp.lt.u32.totalorder %s232_s16, %s325_s3 }
 0x10c   :  { %p238_p9 = pnand %p236_p8, %p233_p7 }
 0x10e   :  { %241 = shalt.err (!%p238_p9)
}
 0x10f   :  { %137 = dma.vmem_to_hbm [thread:$0]  %s135_s12, 128, %s325_s3, [#allocation4]  }
 0x110   :  { %246 = dma.done.wait [#allocation4], 128  }
 0x111   :  { %247 = vsyncadd [#allocation4], 4294967168 }
 0x112   :  { %141 = vsyncpa [#allocation3], 1 }
 0x113   :  { %142 = vsyncpa [#allocation6], 1 }
 0x114   :  { %143 = vsyncpa [#allocation4], 1 }

</bundles_post_ra>
